<compile_context>
chip_gen: v5e
topology: v5e:2x2
jax: 0.10.0
libtpu: 0.0.40
codegen_flags: <defaults>
</compile_context>

<pallas_src>
import functools
import inspect

import jax
import jax.numpy as jnp
from jax.experimental import pallas as pl
from jax.experimental.pallas import tpu as pltpu

LANE = 128


def _round_up(x, m):
    return ((x + m - 1) // m) * m


def _pad_to(a, shape):
    if tuple(a.shape) == tuple(shape):
        return a
    return jnp.pad(a, [(0, s - d) for d, s in zip(a.shape, shape)])


@functools.lru_cache(maxsize=None)
def _supports_single_buffering():
    """Feature-detect pl.Buffered + BlockSpec(pipeline_mode=...) up front so we
    never have to catch (and risk swallowing) real compile errors later."""
    if not hasattr(pl, "Buffered"):
        return False
    try:
        return "pipeline_mode" in inspect.signature(pl.BlockSpec).parameters
    except (TypeError, ValueError):
        return False


@functools.lru_cache(maxsize=None)
def _vmem_budget_bytes():
    """~85% of this generation's VMEM (128 MiB v5e/v6e, 64 MiB v7x)."""
    try:
        cap = int(getattr(pltpu.get_tpu_info(), "vmem_capacity_bytes", 0))
        if cap > 0:
            return int(0.85 * cap)
    except Exception:  # hardware-info query only; kernel errors are never caught
        pass
    return 64 << 20  # conservative v7x-sized fallback


# ----------------------------- kernels ------------------------------------ #

def _mlp_l2_resident_kernel(x_ref, w1_ref, b1_ref, w2_ref, b2_ref, o_ref):
    # Layer 1: MXU matmul in the operand dtype, f32 accumulator; f32 epilogue.
    h = jnp.dot(x_ref[...], w1_ref[...], preferred_element_type=jnp.float32)
    h = jnp.maximum(h + b1_ref[...], 0.0)            # b1 is [1, H] -> broadcasts
    # Layer 2: cast hidden back to the weight dtype so the MXU stays at peak.
    h = h.astype(w2_ref.dtype)
    y = jnp.dot(h, w2_ref[...], preferred_element_type=jnp.float32)
    y = jnp.maximum(y + b2_ref[...], 0.0)
    o_ref[...] = y.astype(o_ref.dtype)


def _mlp_l2_dout_tiled_kernel(x_ref, w1_ref, b1_ref, w2_ref, b2_ref, o_ref,
                              h_ref):
    # D_out-tiled variant: grid = (batch tiles, D_out tiles).  The hidden
    # activation is computed once per batch tile (at j == 0) and kept in VMEM
    # scratch in the compute dtype, then reused for every D_out tile.
    @pl.when(pl.program_id(1) == 0)
    def _():
        h = jnp.dot(x_ref[...], w1_ref[...], preferred_element_type=jnp.float32)
        h = jnp.maximum(h + b1_ref[...], 0.0)
        h_ref[...] = h.astype(h_ref.dtype)

    y = jnp.dot(h_ref[...], w2_ref[...], preferred_element_type=jnp.float32)
    y = jnp.maximum(y + b2_ref[...], 0.0)
    o_ref[...] = y.astype(o_ref.dtype)


# ------------------------- parameter preparation --------------------------- #

def prepare_params(w1, b1, w2, b2, *, compute_dtype=None):
    """Cast + pad the (static) weights/biases ONCE; reuse across forward calls
    so per-call HBM traffic is only x and the output.

    w1 : [D_in, H]    (transposed nn.Linear weight)
    b1 : [H]
    w2 : [H, D_out]   (transposed nn.Linear weight)
    b2 : [D_out]
    compute_dtype : dtype fed to the MXU (jnp.bfloat16 recommended on v6e/v7x).
    """
    compute_dtype = jnp.dtype(compute_dtype if compute_dtype is not None
                              else w1.dtype)
    D_in, H = w1.shape
    H2, D_out = w2.shape
    assert H2 == H and b1.shape == (H,) and b2.shape == (D_out,)
    D_in_p, H_p, D_out_p = (_round_up(d, LANE) for d in (D_in, H, D_out))
    # Zero padding is exact for this ReLU MLP: padded rows/cols contribute 0
    # and the padded output region is cropped.
    return dict(
        w1=_pad_to(w1.astype(compute_dtype), (D_in_p, H_p)),
        b1=_pad_to(b1.astype(jnp.float32).reshape(1, H), (1, H_p)),
        w2=_pad_to(w2.astype(compute_dtype), (H_p, D_out_p)),
        b2=_pad_to(b2.astype(jnp.float32).reshape(1, D_out), (1, D_out_p)),
        dims=(D_in, H, D_out),
        compute_dtype=compute_dtype,
    )


# ------------------------------ forward ------------------------------------ #

def _pick_block_b(block_b, B, sub, avail_bytes, per_row_bytes):
    if block_b is None:
        fit = max(sub, (int(avail_bytes) // max(int(per_row_bytes), 1))
                  // sub * sub)
        cap = min(fit, 1024)  # >1024 rows buys <1% extra HBM roofline
        if B < 2 * sub:
            block_b = _round_up(max(B, sub), sub)
        else:
            # >= 2 grid steps (even count): pipelines x/out DMA against the
            # matmuls and lets v7x shard the batch axis across its 2 TCs.
            n_steps = max(2, pl.cdiv(_round_up(B, sub), cap))
            n_steps += n_steps % 2
            block_b = min(cap, _round_up(pl.cdiv(B, n_steps), sub))
    block_b = max(sub, _round_up(block_b, sub))
    return min(block_b, _round_up(B, sub))


def mlp_l2_pallas_prepared(x, params, *, block_b=None, block_n=None):
    """Fused MLP_L2 forward using pre-padded/cast params from prepare_params.

    x : [B, D_in];  returns [B, D_out] in x.dtype.
    """
    D_in, H, D_out = params["dims"]
    B, D_in_x = x.shape
    assert D_in_x == D_in, f"x has D_in={D_in_x}, params expect {D_in}"

    compute_dtype = params["compute_dtype"]
    w1_p, b1_p, w2_p, b2_p = params["w1"], params["b1"], params["w2"], params["b2"]
    D_in_p, H_p = w1_p.shape
    D_out_p = w2_p.shape[1]

    out_dtype = x.dtype
    bpe = jnp.dtype(compute_dtype).itemsize
    out_bpe = jnp.dtype(out_dtype).itemsize
    sub = 8 if bpe >= 4 else (16 if bpe == 2 else 32)   # sublane multiple

    budget = _vmem_budget_bytes()
    single_buf = _supports_single_buffering()
    w_buf = 1 if single_buf else 2
    slack = 2 << 20

    weight_bytes = (D_in_p * H_p + H_p * D_out_p) * bpe + (H_p + D_out_p) * 4
    # Switch to D_out tiling when resident weights would eat too much of this
    # generation's VMEM (triggers ~2x earlier on v7x's 64 MiB).
    tile_dout = (block_n is not None) or (w_buf * weight_bytes > 0.4 * budget)

    flops = 2 * B * D_in_p * H_p + 2 * B * H_p * D_out_p

    if not tile_dout:
        # ----------------- weights fully resident in VMEM ----------------- #
        fixed = w_buf * weight_bytes + slack
        per_row = (2 * D_in_p * bpe                 # x tile, double-buffered
                   + 2 * D_out_p * out_bpe          # out tile, double-buffered
                   + H_p * (4 + bpe)                # f32 hidden + cast hidden
                   + D_out_p * (4 + out_bpe))       # f32 y + cast y
        block_b = _pick_block_b(block_b, B, sub,
                                0.9 * (budget - fixed), per_row)
        B_p = _round_up(B, block_b)
        grid = (B_p // block_b,)

        vmem_need = fixed - slack + block_b * per_row
        vmem_limit = int(min(budget, max(2 * vmem_need + slack, 16 << 20)))

        cost = pl.CostEstimate(
            flops=flops, transcendentals=0,
            bytes_accessed=(B_p * D_in_p + D_in_p * H_p + H_p * D_out_p) * bpe
            + (H_p + D_out_p) * 4 + B_p * D_out_p * out_bpe)

        def const_spec(shape):
            # Block is constant across the grid -> one VMEM copy is enough.
            if single_buf:
                return pl.BlockSpec(shape, lambda i: (0,) * len(shape),
                                    pipeline_mode=pl.Buffered(1))
            return pl.BlockSpec(shape, lambda i: (0,) * len(shape))

        call = pl.pallas_call(
            _mlp_l2_resident_kernel,
            out_shape=jax.ShapeDtypeStruct((B_p, D_out_p), out_dtype),
            grid_spec=pltpu.PrefetchScalarGridSpec(
                num_scalar_prefetch=0,
                grid=grid,
                in_specs=[
                    pl.BlockSpec((block_b, D_in_p), lambda i: (i, 0)),  # x
                    const_spec((D_in_p, H_p)),                          # W1
                    const_spec((1, H_p)),                               # b1
                    const_spec((H_p, D_out_p)),                         # W2
                    const_spec((1, D_out_p)),                           # b2
                ],
                out_specs=pl.BlockSpec((block_b, D_out_p), lambda i: (i, 0)),
            ),
            compiler_params=pltpu.CompilerParams(
                dimension_semantics=("parallel",),
                vmem_limit_bytes=vmem_limit,
            ),
            cost_estimate=cost,
        )
        x_p = _pad_to(x.astype(compute_dtype), (B_p, D_in_p))
        out_p = call(x_p, w1_p, b1_p, w2_p, b2_p)
        return out_p[:B, :D_out]

    # --------------------------- D_out-tiled mode -------------------------- #
    if block_n is None:
        # Largest lane-multiple divisor of D_out_p whose double-buffered W2
        # slice stays within ~25% of the VMEM budget.
        m = D_out_p // LANE
        cap_elems = max(LANE, int(0.25 * budget) // max(2 * H_p * bpe, 1))
        d_best = 1
        for d in range(1, m + 1):
            if m % d == 0 and LANE * d <= cap_elems:
                d_best = d
        block_n = LANE * d_best
    else:
        block_n = max(LANE, _round_up(min(block_n, D_out_p), LANE))
        while D_out_p % block_n != 0:   # snap down to a divisor of D_out_p
            block_n -= LANE

    fixed = (w_buf * D_in_p * H_p * bpe          # W1 resident
             + 2 * H_p * block_n * bpe           # W2 tile, double-buffered
             + (w_buf * H_p + 2 * block_n) * 4   # biases
             + slack)
    per_row = (2 * D_in_p * bpe                  # x tile, double-buffered
               + 2 * block_n * out_bpe           # out tile, double-buffered
               + H_p * bpe                       # hidden VMEM scratch
               + H_p * 4                         # f32 hidden (layer-1 epilogue)
               + block_n * (4 + out_bpe))        # f32 y + cast y
    block_b = _pick_block_b(block_b, B, sub, 0.9 * (budget - fixed), per_row)
    B_p = _round_up(B, block_b)
    grid = (B_p // block_b, D_out_p // block_n)

    vmem_need = fixed - slack + block_b * per_row
    vmem_limit = int(min(budget, max(2 * vmem_need + slack, 16 << 20)))

    cost = pl.CostEstimate(
        flops=flops, transcendentals=0,
        bytes_accessed=B_p * D_in_p * bpe + D_in_p * H_p * bpe
        + grid[0] * H_p * D_out_p * bpe + B_p * D_out_p * out_bpe)

    def const_spec2(shape):
        if single_buf:
            return pl.BlockSpec(shape, lambda i, j: (0,) * len(shape),
                                pipeline_mode=pl.Buffered(1))
        return pl.BlockSpec(shape, lambda i, j: (0,) * len(shape))

    call = pl.pallas_call(
        _mlp_l2_dout_tiled_kernel,
        out_shape=jax.ShapeDtypeStruct((B_p, D_out_p), out_dtype),
        grid_spec=pltpu.PrefetchScalarGridSpec(
            num_scalar_prefetch=0,
            grid=grid,
            in_specs=[
                pl.BlockSpec((block_b, D_in_p), lambda i, j: (i, 0)),   # x
                const_spec2((D_in_p, H_p)),                             # W1
                const_spec2((1, H_p)),                                  # b1
                pl.BlockSpec((H_p, block_n), lambda i, j: (0, j)),      # W2 tile
                pl.BlockSpec((1, block_n), lambda i, j: (0, j)),        # b2 tile
            ],
            out_specs=pl.BlockSpec((block_b, block_n), lambda i, j: (i, j)),
            scratch_shapes=[pltpu.VMEM((block_b, H_p), compute_dtype)],
        ),
        compiler_params=pltpu.CompilerParams(
            dimension_semantics=("parallel", "arbitrary"),
            vmem_limit_bytes=vmem_limit,
        ),
        cost_estimate=cost,
    )
    x_p = _pad_to(x.astype(compute_dtype), (B_p, D_in_p))
    out_p = call(x_p, w1_p, b1_p, w2_p, b2_p)
    return out_p[:B, :D_out]


def mlp_l2_pallas(x, w1, b1, w2, b2, *, compute_dtype=None, block_b=None,
                  block_n=None):
    """Convenience wrapper (casts/pads the weights on every call).  For
    repeated forwards, call prepare_params() once and use
    mlp_l2_pallas_prepared() to avoid the per-call weight cast/pad HBM cost."""
    params = prepare_params(
        w1, b1, w2, b2,
        compute_dtype=compute_dtype if compute_dtype is not None else x.dtype)
    return mlp_l2_pallas_prepared(x, params, block_b=block_b, block_n=block_n)


# ------------------------------ reference ---------------------------------- #

def init_params(key, input_dim, hidden_dim, output_dim, dtype=jnp.float32):
    """Deterministic init matching nn.Linear shapes (weight: [out, in])."""
    k1, k2, k3, k4 = jax.random.split(key, 4)
    bound1 = 1.0 / (input_dim ** 0.5)
    bound2 = 1.0 / (hidden_dim ** 0.5)
    w1_pt = jax.random.uniform(k1, (hidden_dim, input_dim), dtype, -bound1, bound1)
    b1 = jax.random.uniform(k2, (hidden_dim,), dtype, -bound1, bound1)
    w2_pt = jax.random.uniform(k3, (output_dim, hidden_dim), dtype, -bound2, bound2)
    b2 = jax.random.uniform(k4, (output_dim,), dtype, -bound2, bound2)
    return w1_pt, b1, w2_pt, b2


def reference_forward(x, w1_pt, b1, w2_pt, b2):
    """Pure-JAX reference mirroring the PyTorch forward exactly."""
    h = jnp.maximum(x @ w1_pt.T + b1, 0.0)
    return jnp.maximum(h @ w2_pt.T + b2, 0.0)


if __name__ == "__main__":
    key = jax.random.PRNGKey(0)
    kx, kp = jax.random.split(key)

    # Small shapes consistent with the module.
    batch, input_dim, hidden_dim, output_dim = 8, 32, 32, 16
    x = jax.random.normal(kx, (batch, input_dim), jnp.float32)
    w1_pt, b1, w2_pt, b2 = init_params(kp, input_dim, hidden_dim, output_dim)
    ref = reference_forward(x, w1_pt, b1, w2_pt, b2)

    # (a) prepared-params path: weights cast/padded once, reused across calls.
    params = prepare_params(w1_pt.T, b1, w2_pt.T, b2, compute_dtype=jnp.float32)
    out = jax.block_until_ready(mlp_l2_pallas_prepared(x, params))
    assert out.shape == (batch, output_dim)
    assert jnp.allclose(out, ref, atol=1e-5, rtol=1e-5), "f32 mismatch vs reference"
    out2 = jax.block_until_ready(mlp_l2_pallas_prepared(x, params))
    assert jnp.allclose(out2, ref, atol=1e-5, rtol=1e-5), "param-reuse mismatch"

    # (b) bf16 MXU path (recommended compute dtype on v6e/v7x), looser tol.
    params_bf16 = prepare_params(w1_pt.T, b1, w2_pt.T, b2,
                                 compute_dtype=jnp.bfloat16)
    out_bf16 = jax.block_until_ready(mlp_l2_pallas_prepared(x, params_bf16))
    assert jnp.allclose(out_bf16, ref, atol=5e-2, rtol=5e-2), "bf16 mismatch"

    # (c) larger shape: even, multi-step "parallel" batch grid.
    xb = jax.random.normal(kx, (512, 256), jnp.float32)
    w1b, b1b, w2b, b2b = init_params(kp, 256, 512, 256)
    outb = jax.block_until_ready(mlp_l2_pallas(xb, w1b.T, b1b, w2b.T, b2b))
    refb = reference_forward(xb, w1b, b1b, w2b, b2b)
    assert outb.shape == (512, 256)
    assert jnp.allclose(outb, refb, atol=1e-3, rtol=1e-3), "tiled-batch mismatch"

    # (d) exercise the D_out-tiled (weights-beyond-VMEM-threshold) path.
    xc = jax.random.normal(kx, (256, 256), jnp.float32)
    w1c, b1c, w2c, b2c = init_params(kp, 256, 512, 512)
    outc = jax.block_until_ready(
        mlp_l2_pallas(xc, w1c.T, b1c, w2c.T, b2c, block_n=256))
    refc = reference_forward(xc, w1c, b1c, w2c, b2c)
    assert outc.shape == (256, 512)
    assert jnp.allclose(outc, refc, atol=1e-3, rtol=1e-3), "D_out-tiled mismatch"

    print("KERNEL_OK")
</pallas_src>

<mosaic_0001>
module attributes {stable_mosaic.version = 11 : i64} {
  func.func @_mlp_l2_resident_kernel(%arg0: i32, %arg1: memref<8x128xf32, #tpu.memory_space<vmem>>, %arg2: memref<128x128xf32, #tpu.memory_space<vmem>>, %arg3: memref<1x128xf32, #tpu.memory_space<vmem>>, %arg4: memref<128x128xf32, #tpu.memory_space<vmem>>, %arg5: memref<1x128xf32, #tpu.memory_space<vmem>>, %arg6: memref<8x128xf32, #tpu.memory_space<vmem>>) attributes {dimension_semantics = [#tpu.dimension_semantics<parallel>], iteration_bounds = array<i64: 1>, scalar_prefetch = 0 : i64, scratch_operands = 0 : i64, tpu.core_type = #tpu.core_type<tc>, window_params = [{transform_indices = @transform_0, window_bounds = array<i64: 8, 128>}, {pipeline_mode = #tpu.pipeline_mode<synchronous>, transform_indices = @transform_1, window_bounds = array<i64: 128, 128>}, {pipeline_mode = #tpu.pipeline_mode<synchronous>, transform_indices = @transform_2, window_bounds = array<i64: 1, 128>}, {pipeline_mode = #tpu.pipeline_mode<synchronous>, transform_indices = @transform_3, window_bounds = array<i64: 128, 128>}, {pipeline_mode = #tpu.pipeline_mode<synchronous>, transform_indices = @transform_4, window_bounds = array<i64: 1, 128>}, {transform_indices = @transform_5, window_bounds = array<i64: 8, 128>}]} {
    %c0 = arith.constant 0 : index
    %c0_0 = arith.constant 0 : index
    %0 = vector.load %arg1[%c0, %c0_0] : memref<8x128xf32, #tpu.memory_space<vmem>>, vector<8x128xf32>
    %c0_1 = arith.constant 0 : index
    %c0_2 = arith.constant 0 : index
    %1 = vector.load %arg2[%c0_1, %c0_2] : memref<128x128xf32, #tpu.memory_space<vmem>>, vector<128x128xf32>
    %cst = arith.constant dense<0.000000e+00> : vector<8x128xf32>
    %2 = tpu.matmul %0, %1, %cst {dimension_numbers = #tpu.dot_dimension_numbers<[1], [0], [0], [1], [0, 0, 1, 1], [], []>} : vector<8x128xf32>, vector<128x128xf32>, vector<8x128xf32> -> vector<8x128xf32>
    %c0_3 = arith.constant 0 : index
    %c0_4 = arith.constant 0 : index
    %3 = vector.load %arg3[%c0_3, %c0_4] : memref<1x128xf32, #tpu.memory_space<vmem>>, vector<1x128xf32>
    %4 = vector.broadcast %3 : vector<1x128xf32> to vector<8x128xf32>
    %5 = arith.addf %2, %4 : vector<8x128xf32>
    %cst_5 = arith.constant 0.000000e+00 : f32
    %6 = vector.broadcast %cst_5 : f32 to vector<8x128xf32>
    %7 = arith.maximumf %5, %6 : vector<8x128xf32>
    %c0_6 = arith.constant 0 : index
    %c0_7 = arith.constant 0 : index
    %8 = vector.load %arg4[%c0_6, %c0_7] : memref<128x128xf32, #tpu.memory_space<vmem>>, vector<128x128xf32>
    %cst_8 = arith.constant dense<0.000000e+00> : vector<8x128xf32>
    %9 = tpu.matmul %7, %8, %cst_8 {dimension_numbers = #tpu.dot_dimension_numbers<[1], [0], [0], [1], [0, 0, 1, 1], [], []>} : vector<8x128xf32>, vector<128x128xf32>, vector<8x128xf32> -> vector<8x128xf32>
    %c0_9 = arith.constant 0 : index
    %c0_10 = arith.constant 0 : index
    %10 = vector.load %arg5[%c0_9, %c0_10] : memref<1x128xf32, #tpu.memory_space<vmem>>, vector<1x128xf32>
    %11 = vector.broadcast %10 : vector<1x128xf32> to vector<8x128xf32>
    %12 = arith.addf %9, %11 : vector<8x128xf32>
    %cst_11 = arith.constant 0.000000e+00 : f32
    %13 = vector.broadcast %cst_11 : f32 to vector<8x128xf32>
    %14 = arith.maximumf %12, %13 : vector<8x128xf32>
    %c0_12 = arith.constant 0 : index
    %c0_13 = arith.constant 0 : index
    %15 = vector.load %arg6[%c0_12, %c0_13] : memref<8x128xf32, #tpu.memory_space<vmem>>, vector<8x128xf32>
    tpu.vector_store %arg6[%c0_12, %c0_13], %14 {strides = array<i32>} : memref<8x128xf32, #tpu.memory_space<vmem>>, vector<8x128xf32>,
    return
  }
  func.func @transform_0(%arg0: i32) -> (i32, i32) {
    %c0_i32 = arith.constant 0 : i32
    %c0_i32_0 = arith.constant 0 : i32
    return %arg0, %c0_i32 : i32, i32
  }
  func.func @transform_1(%arg0: i32) -> (i32, i32) {
    %c0_i32 = arith.constant 0 : i32
    %c0_i32_0 = arith.constant 0 : i32
    %c0_i32_1 = arith.constant 0 : i32
    return %c0_i32, %c0_i32_0 : i32, i32
  }
  func.func @transform_2(%arg0: i32) -> (i32, i32) {
    %c0_i32 = arith.constant 0 : i32
    %c0_i32_0 = arith.constant 0 : i32
    %c0_i32_1 = arith.constant 0 : i32
    return %c0_i32, %c0_i32_0 : i32, i32
  }
  func.func @transform_3(%arg0: i32) -> (i32, i32) {
    %c0_i32 = arith.constant 0 : i32
    %c0_i32_0 = arith.constant 0 : i32
    %c0_i32_1 = arith.constant 0 : i32
    return %c0_i32, %c0_i32_0 : i32, i32
  }
  func.func @transform_4(%arg0: i32) -> (i32, i32) {
    %c0_i32 = arith.constant 0 : i32
    %c0_i32_0 = arith.constant 0 : i32
    %c0_i32_1 = arith.constant 0 : i32
    return %c0_i32, %c0_i32_0 : i32, i32
  }
  func.func @transform_5(%arg0: i32) -> (i32, i32) {
    %c0_i32 = arith.constant 0 : i32
    %c0_i32_0 = arith.constant 0 : i32
    return %arg0, %c0_i32 : i32, i32
  }
}

</mosaic_0001>

<bundles_post_ra>
// kernel: tpu_custom_call.1
= control target key start
LH: loop header
LB: loop body
LE: loop exit
PB: predicated region body
PF: predicated region fallthrough
CT: control target
= control target key end

     0   :  { %10 = vsyncpa [#allocation3], 0  ;;  %s332_s0 = inlined_call_operand.hbm [shape: f32[8,128], index: 0, kind: input, shape index: {}]   ;;  %s333_s1 = inlined_call_operand.hbm [shape: f32[128,128], index: 1, kind: input, shape index: {}]   ;;  %s334_s2 = inlined_call_operand.vmem [shape: f32[1,128], index: 2, kind: input, shape index: {}]   ;;  %s335_s3 = inlined_call_operand.hbm [shape: f32[128,128], index: 3, kind: input, shape index: {}]   ;;  %s336_s4 = inlined_call_operand.vmem [shape: f32[1,128], index: 4, kind: input, shape index: {}]   ;;  %s337_s5 = inlined_call_operand.hbm [shape: f32[8,128], index: 5, kind: output, shape index: {}]  }
   0x1   :  { %11 = vsyncpa [#allocation6], 0  ;;  %s28_s20 = sshll.u32 %s333_s1, 4  ;;  %s29_s20 = int_to_ptr.hbm [resolvable:$true] %s28_s20 }
   0x2   :  { %12 = vsyncpa [#allocation4], 0  ;;  %s278_s21 = smov [#allocation5]   ;;  %s18_s25 = sshll.u32 %s332_s0, 4  ;;  %s19_s25 = int_to_ptr.hbm [resolvable:$true] %s18_s25 }
   0x3   :  { %s30_s22 = sshll.u32 %s278_s21, 4  ;;  %s279_s26 = smov 128   ;;  %s31_s22 = int_to_ptr.vmem [resolvable:$true] %s30_s22 }
   0x4   :  { %s280_s27 = smov 8   ;;  %s281_s28 = smov [#allocation2]  }
   0x5   :  { %36 = dma.hbm_to_vmem [thread:$0]  %s29_s20, 2048, %s31_s22, [#allocation6], %s279_s26, %s279_s26, %s280_s27  }
   0x6   :  { %s20_s29 = sshll.u32 %s281_s28, 4  ;;  %s43_s7 = sshll.u32 %s335_s3, 4  ;;  %s21_s29 = int_to_ptr.vmem [resolvable:$true] %s20_s29  ;;  %s44_s7 = int_to_ptr.hbm [resolvable:$true] %s43_s7 }
   0x7   :  { %23 = dma.hbm_to_vmem [thread:$0]  %s19_s25, 128, %s21_s29, [#allocation3]  }
   0x8   :  { %s282_s1 = smov [#allocation7]  }
   0x9   :  { %s45_s8 = sshll.u32 %s282_s1, 4  ;;  %s46_s8 = int_to_ptr.vmem [resolvable:$true] %s45_s8 }
   0xa   :  { %51 = dma.hbm_to_vmem [thread:$0]  %s44_s7, 2048, %s46_s8, [#allocation6], %s279_s26, %s279_s26, %s280_s27  }
   0xb   :  { %272 = dma.done.wait [#allocation3], 128  }
   0xc   :  { %273 = vsyncadd [#allocation3], 4294967168 }
   0xd   :  { %274 = dma.done.wait [#allocation6], 4096  }
   0xe   :  { %275 = vsyncadd [#allocation6], 4294963200  ;;  %v82_v0 = vld [vmem:[#allocation5 + $0x78] sm:$0xff]  ;;  %v81_v1 = vld [vmem:[#allocation5 + $0x70] sm:$0xff]  ;;  %s283_s11 = smov [#allocation8]   ;;  %s157_s15 = sshll.u32 %s337_s5, 4  ;;  %s158_s15 = int_to_ptr.hbm [resolvable:$true] %s157_s15 }
   0xf   :  { %87 = vmatpush.msra.mxu0 %v82_v0  ;;  %v80_v2 = vld [vmem:[#allocation5 + $0x68] sm:$0xff]  ;;  %v79_v3 = vld [vmem:[#allocation5 + $0x60] sm:$0xff]  ;;  %v123_v4 = vld [vmem:[#allocation7 + $0x78] sm:$0xff]  ;;  %s155_s12 = sshll.u32 %s283_s11, 4  ;;  %s156_s12 = int_to_ptr.vmem [resolvable:$true] %s155_s12 }
  0x10   :  { %v78_v5 = vld [vmem:[#allocation5 + $0x58] sm:$0xff]  ;;  %128 = vmatpush.msra.mxu1 %v123_v4  ;;  %v122_v6 = vld [vmem:[#allocation7 + $0x70] sm:$0xff]  ;;  %v121_v7 = vld [vmem:[#allocation7 + $0x68] sm:$0xff] }
  0x11   :  { %88 = vmatpush.msra.mxu0 %v81_v1  ;;  %v77_v8 = vld [vmem:[#allocation5 + $0x50] sm:$0xff]  ;;  %v120_v9 = vld [vmem:[#allocation7 + $0x60] sm:$0xff]  ;;  %v76_v10 = vld [vmem:[#allocation5 + $0x48] sm:$0xff] }
  0x12   :  { %129 = vmatpush.msra.mxu1 %v122_v6  ;;  %v119_v11 = vld [vmem:[#allocation7 + $0x58] sm:$0xff]  ;;  %v75_v12 = vld [vmem:[#allocation5 + $0x40] sm:$0xff]  ;;  %v118_v13 = vld [vmem:[#allocation7 + $0x50] sm:$0xff] }
  0x13   :  { %89 = vmatpush.msra.mxu0 %v80_v2  ;;  %v74_v14 = vld [vmem:[#allocation5 + $0x38] sm:$0xff]  ;;  %v117_v15 = vld [vmem:[#allocation7 + $0x48] sm:$0xff]  ;;  %v73_v16 = vld [vmem:[#allocation5 + $0x30] sm:$0xff] }
  0x14   :  { %130 = vmatpush.msra.mxu1 %v121_v7  ;;  %v116_v17 = vld [vmem:[#allocation7 + $0x40] sm:$0xff]  ;;  %v72_v18 = vld [vmem:[#allocation5 + $0x28] sm:$0xff]  ;;  %v115_v19 = vld [vmem:[#allocation7 + $0x38] sm:$0xff] }
  0x15   :  { %90 = vmatpush.msra.mxu0 %v79_v3  ;;  %v71_v20 = vld [vmem:[#allocation5 + $0x20] sm:$0xff]  ;;  %v114_v21 = vld [vmem:[#allocation7 + $0x30] sm:$0xff]  ;;  %v70_v22 = vld [vmem:[#allocation5 + $0x18] sm:$0xff] }
  0x16   :  { %131 = vmatpush.msra.mxu1 %v120_v9  ;;  %v113_v23 = vld [vmem:[#allocation7 + $0x28] sm:$0xff]  ;;  %v69_v24 = vld [vmem:[#allocation5 + $0x10] sm:$0xff]  ;;  %v112_v25 = vld [vmem:[#allocation7 + $0x20] sm:$0xff] }
  0x17   :  { %91 = vmatpush.msra.mxu0 %v78_v5  ;;  %v68_v26 = vld [vmem:[#allocation5 + $0x8] sm:$0xff]  ;;  %v111_v27 = vld [vmem:[#allocation7 + $0x18] sm:$0xff]  ;;  %v67_v28 = vld [vmem:[#allocation5] sm:$0xff] }
  0x18   :  { %132 = vmatpush.msra.mxu1 %v119_v11  ;;  %v66_v29 = vld [vmem:[#allocation2] sm:$0xff]  ;;  %v110_v30 = vld [vmem:[#allocation7 + $0x10] sm:$0xff]  ;;  %v109_v31 = vld [vmem:[#allocation7 + $0x8] sm:$0xff] }
  0x19   :  { %92 = vmatpush.msra.mxu0 %v77_v8  ;;  %v108_v32 = vld [vmem:[#allocation7] sm:$0xff]  ;;  %v174_v33 = vld [vmem:[%s334_s2] ss:$0 sm:$0xff] }
  0x1a   :  { %133 = vmatpush.msra.mxu1 %v118_v13  ;;  %v175_v37 = vld [vmem:[%s336_s4] ss:$0 sm:$0xff] }
  0x1b   :  { %93 = vmatpush.msra.mxu0 %v76_v10 }
  0x1c   :  { %134 = vmatpush.msra.mxu1 %v117_v15 }
  0x1d   :  { %94 = vmatpush.msra.mxu0 %v75_v12 }
  0x1e   :  { %135 = vmatpush.msra.mxu1 %v116_v17 }
  0x1f   :  { %95 = vmatpush.msra.mxu0 %v74_v14 }
  0x20   :  { %136 = vmatpush.msra.mxu1 %v115_v19 }
  0x21   :  { %96 = vmatpush.msra.mxu0 %v73_v16 }
  0x22   :  { %137 = vmatpush.msra.mxu1 %v114_v21 }
  0x23   :  { %97 = vmatpush.msra.mxu0 %v72_v18 }
  0x24   :  { %138 = vmatpush.msra.mxu1 %v113_v23 }
  0x25   :  { %98 = vmatpush.msra.mxu0 %v71_v20 }
  0x26   :  { %139 = vmatpush.msra.mxu1 %v112_v25 }
  0x27   :  { %99 = vmatpush.msra.mxu0 %v70_v22 }
  0x28   :  { %140 = vmatpush.msra.mxu1 %v111_v27 }
  0x29   :  { %100 = vmatpush.msra.mxu0 %v69_v24 }
  0x2a   :  { %141 = vmatpush.msra.mxu1 %v110_v30 }
  0x2b   :  { %101 = vmatpush.msra.mxu0 %v68_v26 }
  0x2c   :  { %142 = vmatpush.msra.mxu1 %v109_v31 }
  0x2d   :  { %102 = vmatpush.msra.mxu0 %v67_v28 }
  0x2e   :  { %103 = vmatmul.f32.vlgmr.msra.gmra.mxu0 %v66_v29  ;;  %143 = vmatpush.msra.mxu1 %v108_v32 }
  0xab   :  { %v104_v34 = vpop.f32.mrf.mxu0 }
  0xac   :  { %v105_v35 = vadd.f32 %v174_v33, %v104_v34 }
  0xae   :  { %v107_v36 = vmax.f32 %v105_v35, 0.0 }
  0xb0   :  { %144 = vmatmul.f32.vlgmr.msra.gmra.mxu1 %v107_v36 }
 0x12d   :  { %v145_v38 = vpop.f32.mrf.mxu1 }
 0x12e   :  { %v146_v39 = vadd.f32 %v175_v37, %v145_v38 }
 0x130   :  { %v148_v40 = vmax.f32 %v146_v39, 0.0 }
 0x132   :  { %149 = vst [vmem:[#allocation8] sm:$0xff] %v148_v40 }
 0x133   :  { %160 = dma.vmem_to_hbm [thread:$0]  %s156_s12, 128, %s158_s15, [#allocation4]  }
 0x134   :  { %276 = dma.done.wait [#allocation4], 128  }
 0x135   :  { %277 = vsyncadd [#allocation4], 4294967168 }
 0x136   :  { %165 = vsyncpa [#allocation3], 1 }
 0x137   :  { %166 = vsyncpa [#allocation6], 1 }
 0x138   :  { %167 = vsyncpa [#allocation4], 1 }

</bundles_post_ra>
